<compile_context>
chip_gen: v5e
topology: v5e:2x2
jax: 0.10.0
libtpu: 0.0.40
codegen_flags: <defaults>
</compile_context>

<pallas_src>
import functools
import math

import jax
import jax.numpy as jnp
import numpy as np
from jax.experimental import pallas as pl
from jax.experimental.pallas import tpu as pltpu

_LANES = 128


def _pad_gate_rows(w, h, hp):
    """Reposition the 4 gate blocks of a (2, 4h, ...) LSTM parameter so each gate
    occupies hp (lane-aligned) rows, zero padded: (2, 4h, ...) -> (2, 4hp, ...)."""
    if hp == h:
        return w
    d = w.shape[0]
    tail = w.shape[2:]
    w4 = w.reshape(d, 4, h, *tail)
    pad = [(0, 0), (0, 0), (0, hp - h)] + [(0, 0)] * len(tail)
    return jnp.pad(w4, pad).reshape(d, 4 * hp, *tail)


def _lstm_cell(gates, c_prev, hidden):
    """PyTorch gate order i | f | g | o; each slice is a whole-vreg lane slice."""
    i_g = jax.nn.sigmoid(gates[:, 0 * hidden:1 * hidden])
    f_g = jax.nn.sigmoid(gates[:, 1 * hidden:2 * hidden])
    g_g = jnp.tanh(gates[:, 2 * hidden:3 * hidden])
    o_g = jax.nn.sigmoid(gates[:, 3 * hidden:4 * hidden])
    c_new = f_g * c_prev + i_g * g_g
    h_new = o_g * jnp.tanh(c_new)
    return h_new, c_new


def _bilstm_kernel(lens_ref, bias_ref, whh_ref, gxf_ref, gxb_ref,
                   encf_ref, encb_ref, lasth_ref, lastc_ref,
                   h_scr, c_scr, *, hidden, t_chunk):
    """One grid step = one time chunk; BOTH directions advance inside it.

    gxf_ref: forward  x-gates chunk (t_chunk, B, 4H) at chunk index c
    gxb_ref: backward x-gates chunk (t_chunk, B, 4H) at chunk index nchunks-1-c
    """
    chunk = pl.program_id(0)
    nchunks = pl.num_programs(0)

    @pl.when(chunk == 0)
    def _():
        h_scr[...] = jnp.zeros_like(h_scr)
        c_scr[...] = jnp.zeros_like(c_scr)

    lens = lens_ref[...]              # (B, 1) int32
    bias_f = bias_ref[0]              # (1, 4H) f32 (tiny; safe to keep live)
    bias_b = bias_ref[1]
    t0 = chunk * t_chunk
    t_last = nchunks * t_chunk - 1

    @pl.loop(0, t_chunk)
    def _(s):
        t_f = t0 + s                  # forward global timestep
        t_b = t_last - t_f            # backward global timestep (reversed scan)

        h_f = h_scr[0]
        h_b = h_scr[1]
        c_f = c_scr[0]
        c_b = c_scr[1]

        # Only the recurrent projections sit on the serial critical path.  The two
        # directions are independent so their MXU pushes overlap.  W_hh is read
        # from VMEM here (not hoisted) to avoid vreg pressure at large H.
        rec_f = jnp.dot(h_f.astype(jnp.bfloat16), whh_ref[0],
                        preferred_element_type=jnp.float32)
        rec_b = jnp.dot(h_b.astype(jnp.bfloat16), whh_ref[1],
                        preferred_element_type=jnp.float32)

        gates_f = gxf_ref[s] + rec_f + bias_f
        gates_b = gxb_ref[t_chunk - 1 - s] + rec_b + bias_b

        hn_f, cn_f = _lstm_cell(gates_f, c_f, hidden)
        hn_b, cn_b = _lstm_cell(gates_b, c_b, hidden)

        m_f = lens > t_f              # (B, 1) valid-timestep masks
        m_b = lens > t_b

        h_scr[0] = jnp.where(m_f, hn_f, h_f)   # freeze state past sequence end
        c_scr[0] = jnp.where(m_f, cn_f, c_f)
        h_scr[1] = jnp.where(m_b, hn_b, h_b)
        c_scr[1] = jnp.where(m_b, cn_b, c_b)

        # pad_packed_sequence semantics: padded positions emit zeros.
        encf_ref[s] = jnp.where(m_f, hn_f, 0.0)
        encb_ref[t_chunk - 1 - s] = jnp.where(m_b, hn_b, 0.0)

    @pl.when(chunk == nchunks - 1)
    def _():
        lasth_ref[...] = h_scr[...]
        lastc_ref[...] = c_scr[...]


def modeling_layer_forward(x, sent_lens, w_ih, w_hh, b_ih, b_hh, *, t_chunk=64):
    """x: (B, T, I) f32; sent_lens: (B,) int.
    w_ih: (2, 4H, I), w_hh: (2, 4H, H), b_ih/b_hh: (2, 4H)  (dir 0 = fwd, 1 = bwd).
    Returns encodings (B, T, 2H), last_state (B, 2H), last_cell (B, 2H)."""
    B, T, I = x.shape
    H = w_hh.shape[2]
    Hp = ((H + _LANES - 1) // _LANES) * _LANES      # lane-aligned hidden size
    Gp = 4 * Hp

    Tc = int(min(t_chunk, T))
    Tp = ((T + Tc - 1) // Tc) * Tc
    nchunks = Tp // Tc

    lens2d = sent_lens.reshape(B, 1).astype(jnp.int32)

    # Lane-aligned, gate-repositioned parameters (zero padding is exact: padded
    # h/c columns stay identically zero through the recurrence).
    w_ih_p = _pad_gate_rows(w_ih.astype(jnp.float32), H, Hp)              # (2,4Hp,I)
    w_hh_p = _pad_gate_rows(w_hh.astype(jnp.float32), H, Hp)              # (2,4Hp,H)
    w_hh_p = jnp.pad(w_hh_p, ((0, 0), (0, 0), (0, Hp - H)))               # (2,4Hp,Hp)
    bias_p = _pad_gate_rows((b_ih + b_hh).astype(jnp.float32), H, Hp)[:, None, :]

    # Hoisted input projection: one dense bf16 matmul (f32 accumulation) over all
    # timesteps / both directions; only the small recurrent dot stays serial.
    x_p = x.astype(jnp.float32)
    if Tp != T:
        x_p = jnp.pad(x_p, ((0, 0), (0, Tp - T), (0, 0)))
    gx = jnp.einsum('bti,dgi->dtbg', x_p.astype(jnp.bfloat16),
                    w_ih_p.astype(jnp.bfloat16),
                    preferred_element_type=jnp.float32).astype(jnp.bfloat16)
    gx_f, gx_b = gx[0], gx[1]                                             # (Tp,B,4Hp)
    whh_t = jnp.transpose(w_hh_p, (0, 2, 1)).astype(jnp.bfloat16)         # (2,Hp,4Hp)

    kernel = functools.partial(_bilstm_kernel, hidden=Hp, t_chunk=Tc)

    enc_f, enc_b, last_h, last_c = pl.pallas_call(
        kernel,
        out_shape=(jax.ShapeDtypeStruct((Tp, B, Hp), jnp.float32),
                   jax.ShapeDtypeStruct((Tp, B, Hp), jnp.float32),
                   jax.ShapeDtypeStruct((2, B, Hp), jnp.float32),
                   jax.ShapeDtypeStruct((2, B, Hp), jnp.float32)),
        grid_spec=pltpu.PrefetchScalarGridSpec(
            num_scalar_prefetch=0,
            grid=(nchunks,),
            in_specs=[
                pl.BlockSpec((B, 1), lambda c: (0, 0)),                    # lens
                pl.BlockSpec((2, 1, Gp), lambda c: (0, 0, 0)),             # bias
                pl.BlockSpec((2, Hp, Gp), lambda c: (0, 0, 0)),            # W_hh^T
                pl.BlockSpec((Tc, B, Gp), lambda c: (c, 0, 0)),            # fwd x-gates
                pl.BlockSpec((Tc, B, Gp),
                             lambda c: (nchunks - 1 - c, 0, 0)),           # bwd x-gates
            ],
            out_specs=[
                pl.BlockSpec((Tc, B, Hp), lambda c: (c, 0, 0)),            # fwd enc
                pl.BlockSpec((Tc, B, Hp),
                             lambda c: (nchunks - 1 - c, 0, 0)),           # bwd enc
                pl.BlockSpec((2, B, Hp), lambda c: (0, 0, 0)),             # last h
                pl.BlockSpec((2, B, Hp), lambda c: (0, 0, 0)),             # last c
            ],
            scratch_shapes=[pltpu.VMEM((2, B, Hp), jnp.float32),           # h state
                            pltpu.VMEM((2, B, Hp), jnp.float32)],          # c state
        ),
        compiler_params=pltpu.CompilerParams(
            dimension_semantics=("arbitrary",)),       # state carried across chunks
    )(lens2d, bias_p, whh_t, gx_f, gx_b)

    # Glue to the PyTorch module's conventions (tiny tensors; fuses under jit).
    enc_fwd = jnp.transpose(enc_f[:T, :, :H], (1, 0, 2))                   # (B, T, H)
    enc_bwd = jnp.transpose(enc_b[:T, :, :H], (1, 0, 2))
    encodings = jnp.concatenate([enc_fwd, enc_bwd], axis=-1)               # (B, T, 2H)
    last_state = jnp.transpose(last_h[:, :, :H], (1, 0, 2)).reshape(B, 2 * H)
    last_cell = jnp.transpose(last_c[:, :, :H], (1, 0, 2)).reshape(B, 2 * H)
    return encodings, last_state, last_cell


def _reference_forward(x, sent_lens, w_ih, w_hh, b_ih, b_hh):
    """Pure-numpy reference matching torch packed bidirectional LSTM."""
    x = np.asarray(x, np.float32)
    lens = np.asarray(sent_lens)
    B, T, I = x.shape
    H = w_hh.shape[2]
    outs = np.zeros((2, B, T, H), np.float32)
    lh = np.zeros((2, B, H), np.float32)
    lc = np.zeros((2, B, H), np.float32)
    for d in range(2):
        Wih = np.asarray(w_ih[d]); Whh = np.asarray(w_hh[d])
        b = np.asarray(b_ih[d] + b_hh[d])
        h = np.zeros((B, H), np.float32); c = np.zeros((B, H), np.float32)
        order = range(T) if d == 0 else range(T - 1, -1, -1)
        for tt in order:
            g = x[:, tt] @ Wih.T + h @ Whh.T + b
            i_g = 1 / (1 + np.exp(-g[:, :H]))
            f_g = 1 / (1 + np.exp(-g[:, H:2 * H]))
            g_g = np.tanh(g[:, 2 * H:3 * H])
            o_g = 1 / (1 + np.exp(-g[:, 3 * H:]))
            c_new = f_g * c + i_g * g_g
            h_new = o_g * np.tanh(c_new)
            m = (lens > tt)[:, None]
            h = np.where(m, h_new, h); c = np.where(m, c_new, c)
            outs[d, :, tt] = np.where(m, h_new, 0.0)
        lh[d] = h; lc[d] = c
    enc = np.concatenate([outs[0], outs[1]], axis=-1)          # (B, T, 2H)
    return enc, np.concatenate([lh[0], lh[1]], -1), np.concatenate([lc[0], lc[1]], -1)


if __name__ == "__main__":
    B, T, I, H = 4, 8, 16, 32

    key = jax.random.PRNGKey(0)
    k_wih, k_whh, k_bih, k_bhh, k_x = jax.random.split(key, 5)
    bound = 1.0 / math.sqrt(H)
    w_ih = jax.random.uniform(k_wih, (2, 4 * H, I), jnp.float32, -bound, bound)
    w_hh = jax.random.uniform(k_whh, (2, 4 * H, H), jnp.float32, -bound, bound)
    b_ih = jax.random.uniform(k_bih, (2, 4 * H), jnp.float32, -bound, bound)
    b_hh = jax.random.uniform(k_bhh, (2, 4 * H), jnp.float32, -bound, bound)

    x = jax.random.normal(k_x, (B, T, I), jnp.float32)
    sent_lens = jnp.array([8, 5, 3, 1], jnp.int32)

    # t_chunk=3 -> three time chunks with a padded tail, exercising the chunked /
    # reversed-chunk pipeline and cross-chunk state carry even at toy size.
    fwd = jax.jit(modeling_layer_forward, static_argnames=("t_chunk",))
    enc, last_state, last_cell = jax.block_until_ready(
        fwd(x, sent_lens, w_ih, w_hh, b_ih, b_hh, t_chunk=3))

    assert enc.shape == (B, T, 2 * H)
    assert last_state.shape == (B, 2 * H)
    assert last_cell.shape == (B, 2 * H)

    ref_enc, ref_h, ref_c = _reference_forward(x, sent_lens, w_ih, w_hh, b_ih, b_hh)
    # bf16 gate streaming (f32 accumulation / f32 state) -> ~1e-3-level deviations.
    np.testing.assert_allclose(np.asarray(enc), ref_enc, atol=1e-2, rtol=1e-2)
    np.testing.assert_allclose(np.asarray(last_state), ref_h, atol=1e-2, rtol=1e-2)
    np.testing.assert_allclose(np.asarray(last_cell), ref_c, atol=1e-2, rtol=1e-2)

    print("KERNEL_OK")
</pallas_src>

<mosaic_0001>
module attributes {stable_mosaic.version = 11 : i64} {
  func.func @_bilstm_kernel(%arg0: i32, %arg1: memref<4x1xi32, #tpu.memory_space<vmem>>, %arg2: memref<2x1x512xf32, #tpu.memory_space<vmem>>, %arg3: memref<2x128x512xbf16, #tpu.memory_space<vmem>>, %arg4: memref<3x4x512xbf16, #tpu.memory_space<vmem>>, %arg5: memref<3x4x512xbf16, #tpu.memory_space<vmem>>, %arg6: memref<3x4x128xf32, #tpu.memory_space<vmem>>, %arg7: memref<3x4x128xf32, #tpu.memory_space<vmem>>, %arg8: memref<2x4x128xf32, #tpu.memory_space<vmem>>, %arg9: memref<2x4x128xf32, #tpu.memory_space<vmem>>, %arg10: memref<2x4x128xf32, #tpu.memory_space<vmem>>, %arg11: memref<2x4x128xf32, #tpu.memory_space<vmem>>) attributes {dimension_semantics = [#tpu.dimension_semantics<arbitrary>], iteration_bounds = array<i64: 3>, scalar_prefetch = 0 : i64, scratch_operands = 2 : i64, tpu.core_type = #tpu.core_type<tc>, window_params = [{pipeline_mode = #tpu.pipeline_mode<synchronous>, transform_indices = @transform_0, window_bounds = array<i64: 4, 1>}, {pipeline_mode = #tpu.pipeline_mode<synchronous>, transform_indices = @transform_1, window_bounds = array<i64: 2, 1, 512>}, {pipeline_mode = #tpu.pipeline_mode<synchronous>, transform_indices = @transform_2, window_bounds = array<i64: 2, 128, 512>}, {transform_indices = @transform_3, window_bounds = array<i64: 3, 4, 512>}, {transform_indices = @transform_4, window_bounds = array<i64: 3, 4, 512>}, {transform_indices = @transform_5, window_bounds = array<i64: 3, 4, 128>}, {transform_indices = @transform_6, window_bounds = array<i64: 3, 4, 128>}, {pipeline_mode = #tpu.pipeline_mode<synchronous>, transform_indices = @transform_7, window_bounds = array<i64: 2, 4, 128>}, {pipeline_mode = #tpu.pipeline_mode<synchronous>, transform_indices = @transform_8, window_bounds = array<i64: 2, 4, 128>}]} {
    %c0_i32 = arith.constant 0 : i32
    %0 = arith.cmpi eq, %arg0, %c0_i32 : i32
    %1 = arith.extui %0 : i1 to i32
    %c0_i32_0 = arith.constant 0 : i32
    %2 = arith.cmpi ne, %1, %c0_i32_0 : i32
    scf.if %2 {
      %cst = arith.constant 0.000000e+00 : f32
      %13 = vector.broadcast %cst : f32 to vector<2x4x128xf32>
      %c0_11 = arith.constant 0 : index
      %c0_12 = arith.constant 0 : index
      %c0_13 = arith.constant 0 : index
      %14 = vector.load %arg10[%c0_11, %c0_12, %c0_13] : memref<2x4x128xf32, #tpu.memory_space<vmem>>, vector<2x4x128xf32>
      tpu.vector_store %arg10[%c0_11, %c0_12, %c0_13], %13 {strides = array<i32>} : memref<2x4x128xf32, #tpu.memory_space<vmem>>, vector<2x4x128xf32>,
      %cst_14 = arith.constant 0.000000e+00 : f32
      %15 = vector.broadcast %cst_14 : f32 to vector<2x4x128xf32>
      %c0_15 = arith.constant 0 : index
      %c0_16 = arith.constant 0 : index
      %c0_17 = arith.constant 0 : index
      %16 = vector.load %arg11[%c0_15, %c0_16, %c0_17] : memref<2x4x128xf32, #tpu.memory_space<vmem>>, vector<2x4x128xf32>
      tpu.vector_store %arg11[%c0_15, %c0_16, %c0_17], %15 {strides = array<i32>} : memref<2x4x128xf32, #tpu.memory_space<vmem>>, vector<2x4x128xf32>,
    } else {
    }
    %c0 = arith.constant 0 : index
    %c0_1 = arith.constant 0 : index
    %3 = vector.load %arg1[%c0, %c0_1] : memref<4x1xi32, #tpu.memory_space<vmem>>, vector<4x1xi32>
    %c0_2 = arith.constant 0 : index
    %c0_3 = arith.constant 0 : index
    %c0_4 = arith.constant 0 : index
    %4 = vector.load %arg2[%c0_2, %c0_3, %c0_4] : memref<2x1x512xf32, #tpu.memory_space<vmem>>, vector<1x1x512xf32>
    %5 = vector.shape_cast %4 : vector<1x1x512xf32> to vector<1x512xf32>
    %c1 = arith.constant 1 : index
    %c0_5 = arith.constant 0 : index
    %c0_6 = arith.constant 0 : index
    %6 = vector.load %arg2[%c1, %c0_5, %c0_6] : memref<2x1x512xf32, #tpu.memory_space<vmem>>, vector<1x1x512xf32>
    %7 = vector.shape_cast %6 : vector<1x1x512xf32> to vector<1x512xf32>
    %c3_i32 = arith.constant 3 : i32
    %8 = arith.muli %arg0, %c3_i32 : i32
    %c0_i32_7 = arith.constant 0 : i32
    %c3_i32_8 = arith.constant 3 : i32
    %9 = arith.addi %c0_i32_7, %c3_i32_8 : i32
    %c1_i32 = arith.constant 1 : i32
    scf.for %arg12 = %c0_i32_7 to %9 step %c1_i32  : i32 {
      %c1_i32_11 = arith.constant 1 : i32
      %13 = arith.muli %arg12, %c1_i32_11 : i32
      %c0_i32_12 = arith.constant 0 : i32
      %14 = arith.addi %c0_i32_12, %13 : i32
      %15 = arith.addi %8, %14 : i32
      %c8_i32 = arith.constant 8 : i32
      %16 = arith.subi %c8_i32, %15 : i32
      %c0_13 = arith.constant 0 : index
      %c0_14 = arith.constant 0 : index
      %c0_15 = arith.constant 0 : index
      %17 = vector.load %arg10[%c0_13, %c0_14, %c0_15] : memref<2x4x128xf32, #tpu.memory_space<vmem>>, vector<1x4x128xf32>
      %18 = vector.shape_cast %17 : vector<1x4x128xf32> to vector<4x128xf32>
      %c1_16 = arith.constant 1 : index
      %c0_17 = arith.constant 0 : index
      %c0_18 = arith.constant 0 : index
      %19 = vector.load %arg10[%c1_16, %c0_17, %c0_18] : memref<2x4x128xf32, #tpu.memory_space<vmem>>, vector<1x4x128xf32>
      %20 = vector.shape_cast %19 : vector<1x4x128xf32> to vector<4x128xf32>
      %c0_19 = arith.constant 0 : index
      %c0_20 = arith.constant 0 : index
      %c0_21 = arith.constant 0 : index
      %21 = vector.load %arg11[%c0_19, %c0_20, %c0_21] : memref<2x4x128xf32, #tpu.memory_space<vmem>>, vector<1x4x128xf32>
      %22 = vector.shape_cast %21 : vector<1x4x128xf32> to vector<4x128xf32>
      %c1_22 = arith.constant 1 : index
      %c0_23 = arith.constant 0 : index
      %c0_24 = arith.constant 0 : index
      %23 = vector.load %arg11[%c1_22, %c0_23, %c0_24] : memref<2x4x128xf32, #tpu.memory_space<vmem>>, vector<1x4x128xf32>
      %24 = vector.shape_cast %23 : vector<1x4x128xf32> to vector<4x128xf32>
      %25 = arith.truncf %18 : vector<4x128xf32> to vector<4x128xbf16>
      %c0_25 = arith.constant 0 : index
      %c0_26 = arith.constant 0 : index
      %c0_27 = arith.constant 0 : index
      %26 = vector.load %arg3[%c0_25, %c0_26, %c0_27] : memref<2x128x512xbf16, #tpu.memory_space<vmem>>, vector<1x128x512xbf16>
      %27 = vector.shape_cast %26 : vector<1x128x512xbf16> to vector<128x512xbf16>
      %cst = arith.constant dense<0.000000e+00> : vector<4x512xf32>
      %28 = tpu.matmul %25, %27, %cst {dimension_numbers = #tpu.dot_dimension_numbers<[1], [0], [0], [1], [0, 0, 1, 1], [], []>} : vector<4x128xbf16>, vector<128x512xbf16>, vector<4x512xf32> -> vector<4x512xf32>
      %29 = arith.truncf %20 : vector<4x128xf32> to vector<4x128xbf16>
      %c1_28 = arith.constant 1 : index
      %c0_29 = arith.constant 0 : index
      %c0_30 = arith.constant 0 : index
      %30 = vector.load %arg3[%c1_28, %c0_29, %c0_30] : memref<2x128x512xbf16, #tpu.memory_space<vmem>>, vector<1x128x512xbf16>
      %31 = vector.shape_cast %30 : vector<1x128x512xbf16> to vector<128x512xbf16>
      %cst_31 = arith.constant dense<0.000000e+00> : vector<4x512xf32>
      %32 = tpu.matmul %29, %31, %cst_31 {dimension_numbers = #tpu.dot_dimension_numbers<[1], [0], [0], [1], [0, 0, 1, 1], [], []>} : vector<4x128xbf16>, vector<128x512xbf16>, vector<4x512xf32> -> vector<4x512xf32>
      %33 = arith.index_cast %14 : i32 to index
      %c0_32 = arith.constant 0 : index
      %c0_33 = arith.constant 0 : index
      %34 = vector.load %arg4[%33, %c0_32, %c0_33] : memref<3x4x512xbf16, #tpu.memory_space<vmem>>, vector<1x4x512xbf16>
      %35 = vector.shape_cast %34 : vector<1x4x512xbf16> to vector<4x512xbf16>
      %36 = arith.extf %35 : vector<4x512xbf16> to vector<4x512xf32>
      %37 = arith.addf %36, %28 : vector<4x512xf32>
      %38 = vector.broadcast %5 : vector<1x512xf32> to vector<4x512xf32>
      %39 = arith.addf %37, %38 : vector<4x512xf32>
      %c2_i32_34 = arith.constant 2 : i32
      %40 = arith.subi %c2_i32_34, %14 : i32
      %41 = arith.index_cast %40 : i32 to index
      %c0_35 = arith.constant 0 : index
      %c0_36 = arith.constant 0 : index
      %42 = vector.load %arg5[%41, %c0_35, %c0_36] : memref<3x4x512xbf16, #tpu.memory_space<vmem>>, vector<1x4x512xbf16>
      %43 = vector.shape_cast %42 : vector<1x4x512xbf16> to vector<4x512xbf16>
      %44 = arith.extf %43 : vector<4x512xbf16> to vector<4x512xf32>
      %45 = arith.addf %44, %32 : vector<4x512xf32>
      %46 = vector.broadcast %7 : vector<1x512xf32> to vector<4x512xf32>
      %47 = arith.addf %45, %46 : vector<4x512xf32>
      %48 = vector.extract_strided_slice %39 {offsets = [0, 0], sizes = [4, 128], strides = [1, 1]} : vector<4x512xf32> to vector<4x128xf32>
      %49 = arith.negf %48 : vector<4x128xf32>
      %50 = math.exp %49 : vector<4x128xf32>
      %cst_37 = arith.constant 1.000000e+00 : f32
      %51 = vector.broadcast %cst_37 : f32 to vector<4x128xf32>
      %52 = arith.addf %51, %50 : vector<4x128xf32>
      %53 = arith.divf %51, %52 : vector<4x128xf32>
      %54 = vector.extract_strided_slice %39 {offsets = [0, 128], sizes = [4, 128], strides = [1, 1]} : vector<4x512xf32> to vector<4x128xf32>
      %55 = arith.negf %54 : vector<4x128xf32>
      %56 = math.exp %55 : vector<4x128xf32>
      %cst_38 = arith.constant 1.000000e+00 : f32
      %57 = vector.broadcast %cst_38 : f32 to vector<4x128xf32>
      %58 = arith.addf %57, %56 : vector<4x128xf32>
      %59 = arith.divf %57, %58 : vector<4x128xf32>
      %60 = vector.extract_strided_slice %39 {offsets = [0, 256], sizes = [4, 128], strides = [1, 1]} : vector<4x512xf32> to vector<4x128xf32>
      %61 = math.tanh %60 : vector<4x128xf32>
      %62 = vector.extract_strided_slice %39 {offsets = [0, 384], sizes = [4, 128], strides = [1, 1]} : vector<4x512xf32> to vector<4x128xf32>
      %63 = arith.negf %62 : vector<4x128xf32>
      %64 = math.exp %63 : vector<4x128xf32>
      %cst_39 = arith.constant 1.000000e+00 : f32
      %65 = vector.broadcast %cst_39 : f32 to vector<4x128xf32>
      %66 = arith.addf %65, %64 : vector<4x128xf32>
      %67 = arith.divf %65, %66 : vector<4x128xf32>
      %68 = arith.mulf %59, %22 : vector<4x128xf32>
      %69 = arith.mulf %53, %61 : vector<4x128xf32>
      %70 = arith.addf %68, %69 : vector<4x128xf32>
      %71 = math.tanh %70 : vector<4x128xf32>
      %72 = arith.mulf %67, %71 : vector<4x128xf32>
      %73 = vector.extract_strided_slice %47 {offsets = [0, 0], sizes = [4, 128], strides = [1, 1]} : vector<4x512xf32> to vector<4x128xf32>
      %74 = arith.negf %73 : vector<4x128xf32>
      %75 = math.exp %74 : vector<4x128xf32>
      %cst_40 = arith.constant 1.000000e+00 : f32
      %76 = vector.broadcast %cst_40 : f32 to vector<4x128xf32>
      %77 = arith.addf %76, %75 : vector<4x128xf32>
      %78 = arith.divf %76, %77 : vector<4x128xf32>
      %79 = vector.extract_strided_slice %47 {offsets = [0, 128], sizes = [4, 128], strides = [1, 1]} : vector<4x512xf32> to vector<4x128xf32>
      %80 = arith.negf %79 : vector<4x128xf32>
      %81 = math.exp %80 : vector<4x128xf32>
      %cst_41 = arith.constant 1.000000e+00 : f32
      %82 = vector.broadcast %cst_41 : f32 to vector<4x128xf32>
      %83 = arith.addf %82, %81 : vector<4x128xf32>
      %84 = arith.divf %82, %83 : vector<4x128xf32>
      %85 = vector.extract_strided_slice %47 {offsets = [0, 256], sizes = [4, 128], strides = [1, 1]} : vector<4x512xf32> to vector<4x128xf32>
      %86 = math.tanh %85 : vector<4x128xf32>
      %87 = vector.extract_strided_slice %47 {offsets = [0, 384], sizes = [4, 128], strides = [1, 1]} : vector<4x512xf32> to vector<4x128xf32>
      %88 = arith.negf %87 : vector<4x128xf32>
      %89 = math.exp %88 : vector<4x128xf32>
      %cst_42 = arith.constant 1.000000e+00 : f32
      %90 = vector.broadcast %cst_42 : f32 to vector<4x128xf32>
      %91 = arith.addf %90, %89 : vector<4x128xf32>
      %92 = arith.divf %90, %91 : vector<4x128xf32>
      %93 = arith.mulf %84, %24 : vector<4x128xf32>
      %94 = arith.mulf %78, %86 : vector<4x128xf32>
      %95 = arith.addf %93, %94 : vector<4x128xf32>
      %96 = math.tanh %95 : vector<4x128xf32>
      %97 = arith.mulf %92, %96 : vector<4x128xf32>
      %98 = vector.broadcast %15 : i32 to vector<4x1xi32>
      %99 = arith.cmpi sgt, %3, %98 : vector<4x1xi32>
      %100 = vector.broadcast %16 : i32 to vector<4x1xi32>
      %101 = arith.cmpi sgt, %3, %100 : vector<4x1xi32>
      %102 = vector.shape_cast %99 : vector<4x1xi1> to vector<4x1xi1>
      %103 = vector.broadcast %102 : vector<4x1xi1> to vector<4x128xi1>
      %104 = arith.select %103, %72, %18 : vector<4x128xi1>, vector<4x128xf32>
      %c0_43 = arith.constant 0 : index
      %c0_44 = arith.constant 0 : index
      %c0_45 = arith.constant 0 : index
      %105 = vector.load %arg10[%c0_43, %c0_44, %c0_45] : memref<2x4x128xf32, #tpu.memory_space<vmem>>, vector<1x4x128xf32>
      %106 = vector.shape_cast %105 : vector<1x4x128xf32> to vector<4x128xf32>
      %107 = vector.shape_cast %104 : vector<4x128xf32> to vector<1x4x128xf32>
      tpu.vector_store %arg10[%c0_43, %c0_44, %c0_45], %107 {strides = array<i32>} : memref<2x4x128xf32, #tpu.memory_space<vmem>>, vector<1x4x128xf32>,
      %108 = vector.shape_cast %99 : vector<4x1xi1> to vector<4x1xi1>
      %109 = vector.broadcast %108 : vector<4x1xi1> to vector<4x128xi1>
      %110 = arith.select %109, %70, %22 : vector<4x128xi1>, vector<4x128xf32>
      %c0_46 = arith.constant 0 : index
      %c0_47 = arith.constant 0 : index
      %c0_48 = arith.constant 0 : index
      %111 = vector.load %arg11[%c0_46, %c0_47, %c0_48] : memref<2x4x128xf32, #tpu.memory_space<vmem>>, vector<1x4x128xf32>
      %112 = vector.shape_cast %111 : vector<1x4x128xf32> to vector<4x128xf32>
      %113 = vector.shape_cast %110 : vector<4x128xf32> to vector<1x4x128xf32>
      tpu.vector_store %arg11[%c0_46, %c0_47, %c0_48], %113 {strides = array<i32>} : memref<2x4x128xf32, #tpu.memory_space<vmem>>, vector<1x4x128xf32>,
      %114 = vector.shape_cast %101 : vector<4x1xi1> to vector<4x1xi1>
      %115 = vector.broadcast %114 : vector<4x1xi1> to vector<4x128xi1>
      %116 = arith.select %115, %97, %20 : vector<4x128xi1>, vector<4x128xf32>
      %c1_49 = arith.constant 1 : index
      %c0_50 = arith.constant 0 : index
      %c0_51 = arith.constant 0 : index
      %117 = vector.load %arg10[%c1_49, %c0_50, %c0_51] : memref<2x4x128xf32, #tpu.memory_space<vmem>>, vector<1x4x128xf32>
      %118 = vector.shape_cast %117 : vector<1x4x128xf32> to vector<4x128xf32>
      %119 = vector.shape_cast %116 : vector<4x128xf32> to vector<1x4x128xf32>
      tpu.vector_store %arg10[%c1_49, %c0_50, %c0_51], %119 {strides = array<i32>} : memref<2x4x128xf32, #tpu.memory_space<vmem>>, vector<1x4x128xf32>,
      %120 = vector.shape_cast %101 : vector<4x1xi1> to vector<4x1xi1>
      %121 = vector.broadcast %120 : vector<4x1xi1> to vector<4x128xi1>
      %122 = arith.select %121, %95, %24 : vector<4x128xi1>, vector<4x128xf32>
      %c1_52 = arith.constant 1 : index
      %c0_53 = arith.constant 0 : index
      %c0_54 = arith.constant 0 : index
      %123 = vector.load %arg11[%c1_52, %c0_53, %c0_54] : memref<2x4x128xf32, #tpu.memory_space<vmem>>, vector<1x4x128xf32>
      %124 = vector.shape_cast %123 : vector<1x4x128xf32> to vector<4x128xf32>
      %125 = vector.shape_cast %122 : vector<4x128xf32> to vector<1x4x128xf32>
      tpu.vector_store %arg11[%c1_52, %c0_53, %c0_54], %125 {strides = array<i32>} : memref<2x4x128xf32, #tpu.memory_space<vmem>>, vector<1x4x128xf32>,
      %cst_55 = arith.constant 0.000000e+00 : f32
      %126 = vector.shape_cast %99 : vector<4x1xi1> to vector<4x1xi1>
      %127 = vector.broadcast %126 : vector<4x1xi1> to vector<4x128xi1>
      %128 = vector.broadcast %cst_55 : f32 to vector<4x128xf32>
      %129 = arith.select %127, %72, %128 : vector<4x128xi1>, vector<4x128xf32>
      %130 = arith.index_cast %14 : i32 to index
      %c0_56 = arith.constant 0 : index
      %c0_57 = arith.constant 0 : index
      %131 = vector.load %arg6[%130, %c0_56, %c0_57] : memref<3x4x128xf32, #tpu.memory_space<vmem>>, vector<1x4x128xf32>
      %132 = vector.shape_cast %131 : vector<1x4x128xf32> to vector<4x128xf32>
      %133 = vector.shape_cast %129 : vector<4x128xf32> to vector<1x4x128xf32>
      tpu.vector_store %arg6[%130, %c0_56, %c0_57], %133 {strides = array<i32>} : memref<3x4x128xf32, #tpu.memory_space<vmem>>, vector<1x4x128xf32>,
      %cst_58 = arith.constant 0.000000e+00 : f32
      %134 = vector.shape_cast %101 : vector<4x1xi1> to vector<4x1xi1>
      %135 = vector.broadcast %134 : vector<4x1xi1> to vector<4x128xi1>
      %136 = vector.broadcast %cst_58 : f32 to vector<4x128xf32>
      %137 = arith.select %135, %97, %136 : vector<4x128xi1>, vector<4x128xf32>
      %c2_i32_59 = arith.constant 2 : i32
      %138 = arith.subi %c2_i32_59, %14 : i32
      %139 = arith.index_cast %138 : i32 to index
      %c0_60 = arith.constant 0 : index
      %c0_61 = arith.constant 0 : index
      %140 = vector.load %arg7[%139, %c0_60, %c0_61] : memref<3x4x128xf32, #tpu.memory_space<vmem>>, vector<1x4x128xf32>
      %141 = vector.shape_cast %140 : vector<1x4x128xf32> to vector<4x128xf32>
      %142 = vector.shape_cast %137 : vector<4x128xf32> to vector<1x4x128xf32>
      tpu.vector_store %arg7[%139, %c0_60, %c0_61], %142 {strides = array<i32>} : memref<3x4x128xf32, #tpu.memory_space<vmem>>, vector<1x4x128xf32>,
    }
    %c3_i32_9 = arith.constant 3 : i32
    %c2_i32 = arith.constant 2 : i32
    %10 = arith.cmpi eq, %arg0, %c2_i32 : i32
    %11 = arith.extui %10 : i1 to i32
    %c0_i32_10 = arith.constant 0 : i32
    %12 = arith.cmpi ne, %11, %c0_i32_10 : i32
    scf.if %12 {
      %c0_11 = arith.constant 0 : index
      %c0_12 = arith.constant 0 : index
      %c0_13 = arith.constant 0 : index
      %13 = vector.load %arg10[%c0_11, %c0_12, %c0_13] : memref<2x4x128xf32, #tpu.memory_space<vmem>>, vector<2x4x128xf32>
      %c0_14 = arith.constant 0 : index
      %c0_15 = arith.constant 0 : index
      %c0_16 = arith.constant 0 : index
      %14 = vector.load %arg8[%c0_14, %c0_15, %c0_16] : memref<2x4x128xf32, #tpu.memory_space<vmem>>, vector<2x4x128xf32>
      tpu.vector_store %arg8[%c0_14, %c0_15, %c0_16], %13 {strides = array<i32>} : memref<2x4x128xf32, #tpu.memory_space<vmem>>, vector<2x4x128xf32>,
      %c0_17 = arith.constant 0 : index
      %c0_18 = arith.constant 0 : index
      %c0_19 = arith.constant 0 : index
      %15 = vector.load %arg11[%c0_17, %c0_18, %c0_19] : memref<2x4x128xf32, #tpu.memory_space<vmem>>, vector<2x4x128xf32>
      %c0_20 = arith.constant 0 : index
      %c0_21 = arith.constant 0 : index
      %c0_22 = arith.constant 0 : index
      %16 = vector.load %arg9[%c0_20, %c0_21, %c0_22] : memref<2x4x128xf32, #tpu.memory_space<vmem>>, vector<2x4x128xf32>
      tpu.vector_store %arg9[%c0_20, %c0_21, %c0_22], %15 {strides = array<i32>} : memref<2x4x128xf32, #tpu.memory_space<vmem>>, vector<2x4x128xf32>,
    } else {
    }
    return
  }
  func.func @transform_0(%arg0: i32) -> (i32, i32) {
    %c0_i32 = arith.constant 0 : i32
    %c0_i32_0 = arith.constant 0 : i32
    %c0_i32_1 = arith.constant 0 : i32
    return %c0_i32, %c0_i32_0 : i32, i32
  }
  func.func @transform_1(%arg0: i32) -> (i32, i32, i32) {
    %c0_i32 = arith.constant 0 : i32
    %c0_i32_0 = arith.constant 0 : i32
    %c0_i32_1 = arith.constant 0 : i32
    %c0_i32_2 = arith.constant 0 : i32
    return %c0_i32, %c0_i32_0, %c0_i32_1 : i32, i32, i32
  }
  func.func @transform_2(%arg0: i32) -> (i32, i32, i32) {
    %c0_i32 = arith.constant 0 : i32
    %c0_i32_0 = arith.constant 0 : i32
    %c0_i32_1 = arith.constant 0 : i32
    %c0_i32_2 = arith.constant 0 : i32
    return %c0_i32, %c0_i32_0, %c0_i32_1 : i32, i32, i32
  }
  func.func @transform_3(%arg0: i32) -> (i32, i32, i32) {
    %c0_i32 = arith.constant 0 : i32
    %c0_i32_0 = arith.constant 0 : i32
    %c0_i32_1 = arith.constant 0 : i32
    return %arg0, %c0_i32, %c0_i32_0 : i32, i32, i32
  }
  func.func @transform_4(%arg0: i32) -> (i32, i32, i32) {
    %c2_i32 = arith.constant 2 : i32
    %0 = arith.subi %c2_i32, %arg0 : i32
    %c0_i32 = arith.constant 0 : i32
    %c0_i32_0 = arith.constant 0 : i32
    %c0_i32_1 = arith.constant 0 : i32
    return %0, %c0_i32, %c0_i32_0 : i32, i32, i32
  }
  func.func @transform_5(%arg0: i32) -> (i32, i32, i32) {
    %c0_i32 = arith.constant 0 : i32
    %c0_i32_0 = arith.constant 0 : i32
    %c0_i32_1 = arith.constant 0 : i32
    return %arg0, %c0_i32, %c0_i32_0 : i32, i32, i32
  }
  func.func @transform_6(%arg0: i32) -> (i32, i32, i32) {
    %c2_i32 = arith.constant 2 : i32
    %0 = arith.subi %c2_i32, %arg0 : i32
    %c0_i32 = arith.constant 0 : i32
    %c0_i32_0 = arith.constant 0 : i32
    %c0_i32_1 = arith.constant 0 : i32
    return %0, %c0_i32, %c0_i32_0 : i32, i32, i32
  }
  func.func @transform_7(%arg0: i32) -> (i32, i32, i32) {
    %c0_i32 = arith.constant 0 : i32
    %c0_i32_0 = arith.constant 0 : i32
    %c0_i32_1 = arith.constant 0 : i32
    %c0_i32_2 = arith.constant 0 : i32
    return %c0_i32, %c0_i32_0, %c0_i32_1 : i32, i32, i32
  }
  func.func @transform_8(%arg0: i32) -> (i32, i32, i32) {
    %c0_i32 = arith.constant 0 : i32
    %c0_i32_0 = arith.constant 0 : i32
    %c0_i32_1 = arith.constant 0 : i32
    %c0_i32_2 = arith.constant 0 : i32
    return %c0_i32, %c0_i32_0, %c0_i32_1 : i32, i32, i32
  }
}

</mosaic_0001>

<bundles_post_ra>
// kernel: modeling_layer_forward.1
= control target key start
LH: loop header
LB: loop body
LE: loop exit
PB: predicated region body
PF: predicated region fallthrough
CT: control target
= control target key end

     0   :  { %s1743_s27 = smov 0   ;;  %s2288_s0 = inlined_call_operand.vmem [shape: s32[4,1], index: 0, kind: input, shape index: {}]   ;;  %s2289_s1 = inlined_call_operand.vmem [shape: f32[2,1,512], index: 1, kind: input, shape index: {}]   ;;  %s2290_s2 = inlined_call_operand.vmem [shape: bf16[2,128,512], index: 2, kind: input, shape index: {}]   ;;  %s2291_s3 = inlined_call_operand.vmem [shape: bf16[9,4,512], index: 3, kind: input, shape index: {}]   ;;  %s2292_s4 = inlined_call_operand.vmem [shape: bf16[9,4,512], index: 4, kind: input, shape index: {}]   ;;  %s2293_s5 = inlined_call_operand.vmem [shape: f32[9,4,128], index: 5, kind: output, shape index: {0}]   ;;  %s2294_s6 = inlined_call_operand.vmem [shape: f32[9,4,128], index: 6, kind: output, shape index: {1}]   ;;  %s2295_s7 = inlined_call_operand.vmem [shape: f32[2,4,128], index: 7, kind: output, shape index: {2}]   ;;  %s2296_s8 = inlined_call_operand.vmem [shape: f32[2,4,128], index: 8, kind: output, shape index: {3}]  }
   0x1 LB: > { %s1749_s28 = sadd.s32 4294967295, %s1690_s27   ;;  %p1251_p0 = scmp.ge.s32.totalorder %s1690_s27, 1  ;;  %s1690_s27 = sphi %s1743_s27, %s19_s27  }
   0x2   : > { %p279_p1 = scmp.lt.s32.totalorder %s1690_s27, 4 }
   0x4   : > { %p280_p2 = pnand %p1251_p0, %p279_p1 }
   0x5   : > { %s1754_s29 = smul.u32 (!%p280_p2), 3, %s1749_s28  ;;  %s334_s30 = ssub.s32 (!%p280_p2), 2, %s1749_s28 }
   0x6   : > { %283 = sbr.rel (%p280_p2) target bundleno = 282 (0x11a), region = 40  ;;  %p1258_p5 = scmp.ne.s32.totalorder (!%p280_p2), %s1749_s28, 0 }
   0x7   : > { %s335_s9 = smul.u32 (!%p280_p2), 3, %s334_s30  ;;  %p328_p3 = scmp.lt.s32.totalorder (!%p280_p2), %s1754_s29, 8 }
   0x9   : > { %p336_p4 = scmp.lt.s32.totalorder (!%p280_p2), %s335_s9, 8 }
   0xb   : > { %s329_s10 = scalar_select %p328_p3, %s1754_s29, 8 }
   0xc   : > { %s2306_s9 = smov (!%p336_p4, %s335_s9), 8 }
   0xd   : > { %s1561_s11 = sshll.u32 %s329_s10, 3  ;;  %s1256_s12 = sshll.u32 %s329_s10, 2 }
   0xe   : > { %s1762_s15 = scalar_lea.vmem %s2291_s3, %s1561_s11  ;;  %s1562_s16 = sshll.u32 %s2306_s9, 3 }
   0xf   : > { %s1767_s19 = scalar_lea.vmem %s2292_s4, %s1562_s16  ;;  %s1772_s22 = scalar_lea.vmem %s2293_s5, %s1256_s12 }
  0x10   : > { %s1257_s23 = sshll.u32 %s2306_s9, 2  ;;  %360 = sbr.rel (%p1258_p5) target bundleno = 26 (0x1a), region = 44 }
  0x11   : > { %s1777_s26 = scalar_lea.vmem %s2294_s6, %s1257_s23 }
  0x15   : > { %v1696_v0 = vmov 0.0  }
  0x16   : > { %361 = vst [vmem:[#allocation2] sm:$0xf] %v1696_v0 }
  0x17   : > { %362 = vst [vmem:[#allocation2 + $0x4] sm:$0xf] %v1696_v0 }
  0x18   : > { %363 = vst [vmem:[#allocation3] sm:$0xf] %v1696_v0 }
  0x19   : > { %364 = vst [vmem:[#allocation3 + $0x4] sm:$0xf] %v1696_v0 }
  0x1a PF: > { %v1783_v1 = vld [vmem:[%s2288_s0] sm:$0xf]  ;;  %v1793_v3 = vld [vmem:[%s2289_s1 + $0x4] sm:$0xf]  ;;  %s1795_s14 = smov 0  }
  0x1b   : > { %v1788_v2 = vld [vmem:[%s2289_s1] sm:$0xf] }
  0x1c LB: >> { %v1374_v4 = vld [vmem:[%s2290_s2 + $0xe0] sm:$0xf]  ;;  %v1593_v5 = vld [vmem:[%s2290_s2 + $0xec] sm:$0xf0]  ;;  %v1591_v6 = vld [vmem:[%s2290_s2 + $0xe4] sm:$0xf]  ;;  %s2064_s21 = sadd.s32 %s1694_s14, %s1754_s29  ;;  %s1694_s14 = sphi %s1795_s14, %s375_s14  }
  0x1d   : >> { %v1375_v7 = vor.u32 %v1593_v5, %v1374_v4  ;;  %v1376_v8 = vld [vmem:[%s2290_s2 + $0xf0] sm:$0xf0]  ;;  %v1382_v9 = vld [vmem:[%s2290_s2 + $0xe8] sm:$0xf]  ;;  %v1594_v10 = vld [vmem:[%s2290_s2 + $0xf4] sm:$0xf0] }
  0x1e   : >> { %v1379_v11 = vor.u32 %v1591_v6, %v1376_v8  ;;  %v1383_v12 = vor.u32 %v1594_v10, %v1382_v9  ;;  %v1592_v13 = vld [vmem:[%s2290_s2 + $0xec] sm:$0xf]  ;;  %v1384_v14 = vld [vmem:[%s2290_s2 + $0xf8] sm:$0xf0]  ;;  %v1358_v15 = vld [vmem:[%s2290_s2 + $0xc0] sm:$0xf] }
  0x1f   : >> { %577 = vmatpush.bf16.msra.mxu0 %v1375_v7  ;;  %v1387_v16 = vor.u32 %v1592_v13, %v1384_v14  ;;  %v1589_v17 = vld [vmem:[%s2290_s2 + $0xcc] sm:$0xf0]  ;;  %v1587_v18 = vld [vmem:[%s2290_s2 + $0xc4] sm:$0xf]  ;;  %v1360_v19 = vld [vmem:[%s2290_s2 + $0xd0] sm:$0xf0] }
  0x20   : >> { %590 = vmatpush.bf16.msra.mxu1 %v1379_v11  ;;  %603 = vmatpush.bf16.msra.mxu2 %v1383_v12  ;;  %v1359_v20 = vor.u32 %v1589_v17, %v1358_v15  ;;  %v1363_v21 = vor.u32 %v1587_v18, %v1360_v19  ;;  %v1366_v22 = vld [vmem:[%s2290_s2 + $0xc8] sm:$0xf]  ;;  %v1590_v23 = vld [vmem:[%s2290_s2 + $0xd4] sm:$0xf0]  ;;  %v1588_v24 = vld [vmem:[%s2290_s2 + $0xcc] sm:$0xf] }
  0x21   : >> { %616 = vmatpush.bf16.msra.mxu3 %v1387_v16  ;;  %v1367_v25 = vor.u32 %v1590_v23, %v1366_v22  ;;  %v1368_v26 = vld [vmem:[%s2290_s2 + $0xd8] sm:$0xf0]  ;;  %v1342_v27 = vld [vmem:[%s2290_s2 + $0xa0] sm:$0xf]  ;;  %v1585_v28 = vld [vmem:[%s2290_s2 + $0xac] sm:$0xf0] }
  0x22   : >> { %v1371_v29 = vor.u32 %v1588_v24, %v1368_v26  ;;  %v1583_v30 = vld [vmem:[%s2290_s2 + $0xa4] sm:$0xf]  ;;  %v1344_v31 = vld [vmem:[%s2290_s2 + $0xb0] sm:$0xf0]  ;;  %v1350_v32 = vld [vmem:[%s2290_s2 + $0xa8] sm:$0xf]  ;;  %v1343_v33 = vor.u32 %v1585_v28, %v1342_v27 }
  0x23   : >> { %578 = vmatpush.bf16.msra.mxu0 %v1359_v20  ;;  %v1586_v34 = vld [vmem:[%s2290_s2 + $0xb4] sm:$0xf0]  ;;  %v1584_v35 = vld [vmem:[%s2290_s2 + $0xac] sm:$0xf]  ;;  %v1352_v36 = vld [vmem:[%s2290_s2 + $0xb8] sm:$0xf0]  ;;  %v1347_v37 = vor.u32 %v1583_v30, %v1344_v31 }
  0x24   : >> { %591 = vmatpush.bf16.msra.mxu1 %v1363_v21  ;;  %604 = vmatpush.bf16.msra.mxu2 %v1367_v25  ;;  %v1351_v38 = vor.u32 %v1586_v34, %v1350_v32  ;;  %v1326_v39 = vld [vmem:[%s2290_s2 + $0x80] sm:$0xf]  ;;  %v1581_v40 = vld [vmem:[%s2290_s2 + $0x8c] sm:$0xf0]  ;;  %v1579_v41 = vld [vmem:[%s2290_s2 + $0x84] sm:$0xf]  ;;  %v1355_v42 = vor.u32 %v1584_v35, %v1352_v36 }
  0x25   : >> { %617 = vmatpush.bf16.msra.mxu3 %v1371_v29  ;;  %v1328_v43 = vld [vmem:[%s2290_s2 + $0x90] sm:$0xf0]  ;;  %v1334_v44 = vld [vmem:[%s2290_s2 + $0x88] sm:$0xf]  ;;  %v1582_v45 = vld [vmem:[%s2290_s2 + $0x94] sm:$0xf0]  ;;  %v1327_v48 = vor.u32 %v1581_v40, %v1326_v39 }
  0x26   : >> { %v1580_v46 = vld [vmem:[%s2290_s2 + $0x8c] sm:$0xf]  ;;  %v1336_v47 = vld [vmem:[%s2290_s2 + $0x98] sm:$0xf0]  ;;  %v1331_v49 = vor.u32 %v1579_v41, %v1328_v43  ;;  %v1335_v50 = vor.u32 %v1582_v45, %v1334_v44  ;;  %v1310_v51 = vld [vmem:[%s2290_s2 + $0x60] sm:$0xf] }
  0x27   : >> { %579 = vmatpush.bf16.msra.mxu0 %v1343_v33  ;;  %v1577_v52 = vld [vmem:[%s2290_s2 + $0x6c] sm:$0xf0]  ;;  %v1575_v53 = vld [vmem:[%s2290_s2 + $0x64] sm:$0xf]  ;;  %v1339_v54 = vor.u32 %v1580_v46, %v1336_v47  ;;  %v1312_v55 = vld [vmem:[%s2290_s2 + $0x70] sm:$0xf0] }
  0x28   : >> { %592 = vmatpush.bf16.msra.mxu1 %v1347_v37  ;;  %605 = vmatpush.bf16.msra.mxu2 %v1351_v38  ;;  %v1318_v56 = vld [vmem:[%s2290_s2 + $0x68] sm:$0xf]  ;;  %v1578_v57 = vld [vmem:[%s2290_s2 + $0x74] sm:$0xf0]  ;;  %v1576_v58 = vld [vmem:[%s2290_s2 + $0x6c] sm:$0xf]  ;;  %v1311_v60 = vor.u32 %v1577_v52, %v1310_v51  ;;  %v1315_v61 = vor.u32 %v1575_v53, %v1312_v55 }
  0x29   : >> { %618 = vmatpush.bf16.msra.mxu3 %v1355_v42  ;;  %v1320_v59 = vld [vmem:[%s2290_s2 + $0x78] sm:$0xf0]  ;;  %v1319_v62 = vor.u32 %v1578_v57, %v1318_v56  ;;  %v1294_v63 = vld [vmem:[%s2290_s2 + $0x40] sm:$0xf]  ;;  %v1573_v0 = vld [vmem:[%s2290_s2 + $0x4c] sm:$0xf0] }
  0x2a   : >> { %v1571_v4 = vld [vmem:[%s2290_s2 + $0x44] sm:$0xf]  ;;  %v1323_v5 = vor.u32 %v1576_v58, %v1320_v59  ;;  %v1296_v6 = vld [vmem:[%s2290_s2 + $0x50] sm:$0xf0]  ;;  %v1302_v7 = vld [vmem:[%s2290_s2 + $0x48] sm:$0xf]  ;;  %v1295_v11 = vor.u32 %v1573_v0, %v1294_v63 }
  0x2b   : >> { %580 = vmatpush.bf16.msra.mxu0 %v1327_v48  ;;  %v1574_v8 = vld [vmem:[%s2290_s2 + $0x54] sm:$0xf0]  ;;  %v1572_v9 = vld [vmem:[%s2290_s2 + $0x4c] sm:$0xf]  ;;  %v1304_v10 = vld [vmem:[%s2290_s2 + $0x58] sm:$0xf0]  ;;  %v1299_v12 = vor.u32 %v1571_v4, %v1296_v6 }
  0x2c   : >> { %593 = vmatpush.bf16.msra.mxu1 %v1331_v49  ;;  %606 = vmatpush.bf16.msra.mxu2 %v1335_v50  ;;  %v1303_v13 = vor.u32 %v1574_v8, %v1302_v7  ;;  %v1278_v14 = vld [vmem:[%s2290_s2 + $0x20] sm:$0xf]  ;;  %v1569_v15 = vld [vmem:[%s2290_s2 + $0x2c] sm:$0xf0]  ;;  %v1567_v16 = vld [vmem:[%s2290_s2 + $0x24] sm:$0xf]  ;;  %v1307_v17 = vor.u32 %v1572_v9, %v1304_v10 }
  0x2d   : >> { %619 = vmatpush.bf16.msra.mxu3 %v1339_v54  ;;  %v1280_v18 = vld [vmem:[%s2290_s2 + $0x30] sm:$0xf0]  ;;  %v1286_v19 = vld [vmem:[%s2290_s2 + $0x28] sm:$0xf]  ;;  %v1570_v20 = vld [vmem:[%s2290_s2 + $0x34] sm:$0xf0]  ;;  %v1279_v23 = vor.u32 %v1569_v15, %v1278_v14 }
  0x2e   : >> { %v1568_v21 = vld [vmem:[%s2290_s2 + $0x2c] sm:$0xf]  ;;  %v1288_v22 = vld [vmem:[%s2290_s2 + $0x38] sm:$0xf0]  ;;  %v1262_v24 = vld [vmem:[%s2290_s2] sm:$0xf]  ;;  %v1283_v26 = vor.u32 %v1567_v16, %v1280_v18  ;;  %v1287_v27 = vor.u32 %v1570_v20, %v1286_v19  ;;  %v1077_v18 = vstv %s2064_s21 }
  0x2f   : >> { %581 = vmatpush.bf16.msra.mxu0 %v1311_v60  ;;  %v1565_v25 = vld [vmem:[%s2290_s2 + $0xc] sm:$0xf0]  ;;  %v1563_v28 = vld [vmem:[%s2290_s2 + $0x4] sm:$0xf]  ;;  %v1264_v29 = vld [vmem:[%s2290_s2 + $0x10] sm:$0xf0]  ;;  %v1291_v31 = vor.u32 %v1568_v21, %v1288_v22  ;;  %vm2101_vm0 = vcmp.gt.s32.totalorder %v1783_v1, %v1077_v18 }
  0x30   : >> { %594 = vmatpush.bf16.msra.mxu1 %v1315_v61  ;;  %607 = vmatpush.bf16.msra.mxu2 %v1319_v62  ;;  %v1270_v30 = vld [vmem:[%s2290_s2 + $0x8] sm:$0xf]  ;;  %v1566_v32 = vld [vmem:[%s2290_s2 + $0x14] sm:$0xf0]  ;;  %v1564_v33 = vld [vmem:[%s2290_s2 + $0xc] sm:$0xf]  ;;  %v1263_v38 = vor.u32 %v1565_v25, %v1262_v24  ;;  %v1267_v42 = vor.u32 %v1563_v28, %v1264_v29 }
  0x31   : >> { %620 = vmatpush.bf16.msra.mxu3 %v1323_v5  ;;  %v1272_v34 = vld [vmem:[%s2290_s2 + $0x18] sm:$0xf0]  ;;  %v1534_v35 = vld [vmem:[%s2290_s2 + $0x1e0] sm:$0xf]  ;;  %v1625_v36 = vld [vmem:[%s2290_s2 + $0x1ec] sm:$0xf0]  ;;  %v1271_v43 = vor.u32 %v1566_v32, %v1270_v30 }
  0x32   : >> { %v1623_v37 = vld [vmem:[%s2290_s2 + $0x1e4] sm:$0xf]  ;;  %v1536_v39 = vld [vmem:[%s2290_s2 + $0x1f0] sm:$0xf0]  ;;  %v1542_v40 = vld [vmem:[%s2290_s2 + $0x1e8] sm:$0xf]  ;;  %v1275_v47 = vor.u32 %v1564_v33, %v1272_v34  ;;  %v1535_v48 = vor.u32 %v1625_v36, %v1534_v35 }
  0x33   : >> { %582 = vmatpush.bf16.msra.mxu0 %v1295_v11  ;;  %v1626_v41 = vld [vmem:[%s2290_s2 + $0x1f4] sm:$0xf0]  ;;  %v1624_v44 = vld [vmem:[%s2290_s2 + $0x1ec] sm:$0xf]  ;;  %v1544_v45 = vld [vmem:[%s2290_s2 + $0x1f8] sm:$0xf0]  ;;  %v1539_v49 = vor.u32 %v1623_v37, %v1536_v39 }
  0x34   : >> { %595 = vmatpush.bf16.msra.mxu1 %v1299_v12  ;;  %608 = vmatpush.bf16.msra.mxu2 %v1303_v13  ;;  %v2016_v46 = vld [vmem:[#allocation2] sm:$0xf]  ;;  %v1543_v50 = vor.u32 %v1626_v41, %v1542_v40  ;;  %v1621_v52 = vld [vmem:[%s2290_s2 + $0x1cc] sm:$0xf0]  ;;  %v1619_v53 = vld [vmem:[%s2290_s2 + $0x1c4] sm:$0xf]  ;;  %v1547_v54 = vor.u32 %v1624_v44, %v1544_v45 }
  0x35   : >> { %621 = vmatpush.bf16.msra.mxu3 %v1307_v17  ;;  %v1518_v51 = vld [vmem:[%s2290_s2 + $0x1c0] sm:$0xf]  ;;  %v384_v55 = vpack.c.bf16 %v2016_v46, %v2016_v46  ;;  %v1520_v56 = vld [vmem:[%s2290_s2 + $0x1d0] sm:$0xf0]  ;;  %v1526_v57 = vld [vmem:[%s2290_s2 + $0x1c8] sm:$0xf] }
  0x36   : >> { %v1622_v58 = vld [vmem:[%s2290_s2 + $0x1d4] sm:$0xf0]  ;;  %v1620_v59 = vld [vmem:[%s2290_s2 + $0x1cc] sm:$0xf]  ;;  %v1528_v60 = vld [vmem:[%s2290_s2 + $0x1d8] sm:$0xf0]  ;;  %v1519_v61 = vor.u32 %v1621_v52, %v1518_v51  ;;  %v1523_v62 = vor.u32 %v1619_v53, %v1520_v56 }
  0x37   : >> { %583 = vmatpush.bf16.msra.mxu0 %v1279_v23  ;;  %v1527_v63 = vor.u32 %v1622_v58, %v1526_v57  ;;  %v1502_v0 = vld [vmem:[%s2290_s2 + $0x1a0] sm:$0xf]  ;;  %v1617_v4 = vld [vmem:[%s2290_s2 + $0x1ac] sm:$0xf0]  ;;  %v1615_v5 = vld [vmem:[%s2290_s2 + $0x1a4] sm:$0xf]  ;;  %v1531_v6 = vor.u32 %v1620_v59, %v1528_v60 }
  0x38   : >> { %596 = vmatpush.bf16.msra.mxu1 %v1283_v26  ;;  %609 = vmatpush.bf16.msra.mxu2 %v1287_v27  ;;  %v1504_v7 = vld [vmem:[%s2290_s2 + $0x1b0] sm:$0xf0]  ;;  %v1510_v8 = vld [vmem:[%s2290_s2 + $0x1a8] sm:$0xf]  ;;  %v1618_v9 = vld [vmem:[%s2290_s2 + $0x1b4] sm:$0xf0]  ;;  %v1503_v12 = vor.u32 %v1617_v4, %v1502_v0 }
  0x39   : >> { %622 = vmatpush.bf16.msra.mxu3 %v1291_v31  ;;  %v1616_v10 = vld [vmem:[%s2290_s2 + $0x1ac] sm:$0xf]  ;;  %v1512_v11 = vld [vmem:[%s2290_s2 + $0x1b8] sm:$0xf0]  ;;  %v1507_v13 = vor.u32 %v1615_v5, %v1504_v7  ;;  %v1511_v14 = vor.u32 %v1618_v9, %v1510_v8  ;;  %v1486_v15 = vld [vmem:[%s2290_s2 + $0x180] sm:$0xf] }
  0x3a   : >> { %v1613_v16 = vld [vmem:[%s2290_s2 + $0x18c] sm:$0xf0]  ;;  %v1611_v17 = vld [vmem:[%s2290_s2 + $0x184] sm:$0xf]  ;;  %v1515_v19 = vor.u32 %v1616_v10, %v1512_v11  ;;  %v1488_v20 = vld [vmem:[%s2290_s2 + $0x190] sm:$0xf0] }
  0x3b   : >> { %584 = vmatpush.bf16.msra.mxu0 %v1263_v38  ;;  %v1494_v21 = vld [vmem:[%s2290_s2 + $0x188] sm:$0xf]  ;;  %v1614_v22 = vld [vmem:[%s2290_s2 + $0x194] sm:$0xf0]  ;;  %v1612_v23 = vld [vmem:[%s2290_s2 + $0x18c] sm:$0xf]  ;;  %v1487_v25 = vor.u32 %v1613_v16, %v1486_v15  ;;  %v1491_v28 = vor.u32 %v1611_v17, %v1488_v20 }
  0x3c   : >> { %597 = vmatpush.bf16.msra.mxu1 %v1267_v42  ;;  %610 = vmatpush.bf16.msra.mxu2 %v1271_v43  ;;  %v1496_v24 = vld [vmem:[%s2290_s2 + $0x198] sm:$0xf0]  ;;  %v1470_v26 = vld [vmem:[%s2290_s2 + $0x160] sm:$0xf]  ;;  %v1495_v29 = vor.u32 %v1614_v22, %v1494_v21  ;;  %v1609_v30 = vld [vmem:[%s2290_s2 + $0x16c] sm:$0xf0] }
  0x3d   : >> { %623 = vmatpush.bf16.msra.mxu3 %v1275_v47  ;;  %v1607_v31 = vld [vmem:[%s2290_s2 + $0x164] sm:$0xf]  ;;  %v1472_v32 = vld [vmem:[%s2290_s2 + $0x170] sm:$0xf0]  ;;  %v1499_v33 = vor.u32 %v1612_v23, %v1496_v24  ;;  %v1478_v34 = vld [vmem:[%s2290_s2 + $0x168] sm:$0xf]  ;;  %v1471_v41 = vor.u32 %v1609_v30, %v1470_v26 }
  0x3e   : >> { %585 = vmatmul.bf16.vlgmr.msra.gmra.mxu0 %v384_v55  ;;  %v1610_v35 = vld [vmem:[%s2290_s2 + $0x174] sm:$0xf0]  ;;  %s377_s11 = ssub.s32 8, %s2064_s21  ;;  %v1608_v36 = vld [vmem:[%s2290_s2 + $0x16c] sm:$0xf]  ;;  %v1697_v38 = vmov 0   ;;  %v1475_v42 = vor.u32 %v1607_v31, %v1472_v32 }
  0x3f   : >> { %823 = vmatpush.bf16.msrb.mxu0 %v1535_v48  ;;  %598 = vmatmul.bf16.vlgmr.msra.gmra.mxu1 %v384_v55  ;;  %v1480_v37 = vld [vmem:[%s2290_s2 + $0x178] sm:$0xf0]  ;;  %v1081_v39 = vsel %vm2101_vm0, 1, %v1697_v38  ;;  %v1079_v40 = vstv %s377_s11  ;;  %v1479_v43 = vor.u32 %v1610_v35, %v1478_v34  ;;  %v1454_v44 = vld [vmem:[%s2290_s2 + $0x140] sm:$0xf]  ;;  %s1627_s30 = sshll.u32 %s1694_s14, 3 }
  0x40   : >> { %836 = vmatpush.bf16.msrb.mxu1 %v1539_v49  ;;  %849 = vmatpush.bf16.msrb.mxu2 %v1543_v50  ;;  %v1605_v45 = vld [vmem:[%s2290_s2 + $0x14c] sm:$0xf0]  ;;  %v1603_v47 = vld [vmem:[%s2290_s2 + $0x144] sm:$0xf]  ;;  %v1483_v48 = vor.u32 %v1608_v36, %v1480_v37  ;;  %v1456_v49 = vld [vmem:[%s2290_s2 + $0x150] sm:$0xf0]  ;;  %vm1080_vm1 = vcmp.gt.s32.totalorder %v1783_v1, %v1079_v40  ;;  %s877_s10 = scalar_lea.vmem %s1762_s15, %s1627_s30 }
  0x41   : >> { %862 = vmatpush.bf16.msrb.mxu3 %v1547_v54  ;;  %611 = vmatmul.bf16.vlgmr.msra.gmra.mxu2 %v384_v55  ;;  %v1462_v50 = vld [vmem:[%s2290_s2 + $0x148] sm:$0xf]  ;;  %v1606_v51 = vld [vmem:[%s2290_s2 + $0x154] sm:$0xf0]  ;;  %v1604_v52 = vld [vmem:[%s2290_s2 + $0x14c] sm:$0xf]  ;;  %v1455_v54 = vor.u32 %v1605_v45, %v1454_v44  ;;  %v1459_v56 = vor.u32 %v1603_v47, %v1456_v49 }
  0x42   : >> { %624 = vmatmul.bf16.vlgmr.msra.gmra.mxu3 %v384_v55  ;;  %1647 = vset.pattern.permute.xlu0 %v1697_v38  ;;  %v1464_v53 = vld [vmem:[%s2290_s2 + $0x158] sm:$0xf0]  ;;  %v1438_v55 = vld [vmem:[%s2290_s2 + $0x120] sm:$0xf]  ;;  %v1463_v57 = vor.u32 %v1606_v51, %v1462_v50  ;;  %v1601_v58 = vld [vmem:[%s2290_s2 + $0x12c] sm:$0xf0] }
  0x43   : >> { %824 = vmatpush.bf16.msrb.mxu0 %v1519_v61  ;;  %1083 = vperm.xlu0 %1647, %v1081_v39   ;;  %v1599_v59 = vld [vmem:[%s2290_s2 + $0x124] sm:$0xf]  ;;  %v1090_v60 = vsel %vm1080_vm1, 1, %v1697_v38  ;;  %v1467_v61 = vor.u32 %v1604_v52, %v1464_v53  ;;  %v1602_v0 = vld [vmem:[%s2290_s2 + $0x134] sm:$0xf0]  ;;  %v896_v24 = vperm.slane %v1788_v2, 1 }
  0x44   : >> { %837 = vmatpush.bf16.msrb.mxu1 %v1523_v62  ;;  %850 = vmatpush.bf16.msrb.mxu2 %v1527_v63  ;;  %v1440_v62 = vld [vmem:[%s2290_s2 + $0x130] sm:$0xf0]  ;;  %v1446_v63 = vld [vmem:[%s2290_s2 + $0x128] sm:$0xf]  ;;  %v1600_v4 = vld [vmem:[%s2290_s2 + $0x12c] sm:$0xf] }
  0x45   : >> { %863 = vmatpush.bf16.msrb.mxu3 %v1531_v6  ;;  %v1448_v5 = vld [vmem:[%s2290_s2 + $0x138] sm:$0xf0]  ;;  %v1439_v6 = vor.u32 %v1601_v58, %v1438_v55  ;;  %v1443_v7 = vor.u32 %v1599_v59, %v1440_v62  ;;  %v1447_v8 = vor.u32 %v1602_v0, %v1446_v63  ;;  %v1422_v9 = vld [vmem:[%s2290_s2 + $0x100] sm:$0xf]  ;;  %v1597_v10 = vld [vmem:[%s2290_s2 + $0x10c] sm:$0xf0] }
  0x46   : >> { %v1595_v11 = vld [vmem:[%s2290_s2 + $0x104] sm:$0xf]  ;;  %v1598_v15 = vld [vmem:[%s2290_s2 + $0x114] sm:$0xf0]  ;;  %v1596_v16 = vld [vmem:[%s2290_s2 + $0x10c] sm:$0xf]  ;;  %v1423_v18 = vor.u32 %v1597_v10, %v1422_v9 }
  0x47   : >> { %825 = vmatpush.bf16.msrb.mxu0 %v1503_v12  ;;  %v1451_v12 = vor.u32 %v1600_v4, %v1448_v5  ;;  %v1432_v17 = vld [vmem:[%s2290_s2 + $0x118] sm:$0xf0]  ;;  %v895_v26 = vperm.slane %v1788_v2, 0  ;;  %v899_v27 = vrot.slane %v896_v24, 4  ;;  %vm887_vm2 = vcmask 1043456   ;;  %s907_s9 = ssub.s32 2, %s1694_s14 }
  0x48   : >> { %838 = vmatpush.bf16.msrb.mxu1 %v1507_v13  ;;  %851 = vmatpush.bf16.msrb.mxu2 %v1511_v14  ;;  %v1424_v13 = vld [vmem:[%s2290_s2 + $0x110] sm:$0xf0]  ;;  %v1430_v14 = vld [vmem:[%s2290_s2 + $0x108] sm:$0xf]  ;;  %v1435_v22 = vor.u32 %v1596_v16, %v1432_v17  ;;  %v898_v32 = vperm.slane %v1788_v2, 3  ;;  %v897_v37 = vperm.slane %v1788_v2, 2 }
  0x49   : >> { %864 = vmatpush.bf16.msrb.mxu3 %v1515_v19  ;;  %v2202_v19 = vld [vmem:[#allocation2 + $0x4] sm:$0xf]  ;;  %v1427_v20 = vor.u32 %v1595_v11, %v1424_v13  ;;  %v1431_v21 = vor.u32 %v1598_v15, %v1430_v14  ;;  %v901_v34 = vsel %vm887_vm2, %v895_v26, %v899_v27  ;;  %s1628_s11 = sshll.u32 %s907_s9, 3  ;;  %v928_v63 = vperm.slane %v1793_v3, 1  ;;  %s1548_s13 = sshll.u32 %s1694_s14, 2 }
  0x4a   : >> { %v629_v23 = vpack.c.bf16 %v2202_v19, %v2202_v19  ;;  %v900_v38 = vrot.slane %v898_v32, 4  ;;  %s910_s12 = scalar_lea.vmem %s1767_s19, %s1628_s11  ;;  %v930_v26 = vperm.slane %v1793_v3, 3  ;;  %s1100_s16 = scalar_lea.vmem %s1772_s22, %s1548_s13 }
  0x4b   : >> { %826 = vmatpush.bf16.msrb.mxu0 %v1487_v25  ;;  %1092 = vperm.xlu0 %1647, %v1090_v60   ;;  %v878_v25 = vld [vmem:[%s877_s10] sm:$0xff]  ;;  %v931_v15 = vrot.slane %v928_v63, 4  ;;  %s1550_s17 = sshll.u32 %s907_s9, 2  ;;  %s375_s14 = sadd.s32 1, %s1694_s14  }
  0x4c   : >> { %839 = vmatpush.bf16.msrb.mxu1 %v1491_v28  ;;  %852 = vmatpush.bf16.msrb.mxu2 %v1495_v29  ;;  %v879_v29 = vunpack.c.l.bf16 %v878_v25  ;;  %v880_v40 = vunpack.c.h.bf16 %v878_v25  ;;  %v902_v50 = vsel %vm887_vm2, %v897_v37, %v900_v38  ;;  %s1103_s21 = scalar_lea.vmem %s1777_s26, %s1550_s17  ;;  %p372_p6 = scmp.ge.s32.totalorder %s375_s14, 3  }
  0x4d   : >> { %865 = vmatpush.bf16.msrb.mxu3 %v1499_v33  ;;  %p1558_p7 = scmp.ne.s32.totalorder (%p372_p6), %s1749_s28, 2 }
  0x4f   : >> { %827 = vmatpush.bf16.msrb.mxu0 %v1471_v41 }
  0x50   : >> { %840 = vmatpush.bf16.msrb.mxu1 %v1475_v42  ;;  %853 = vmatpush.bf16.msrb.mxu2 %v1479_v43 }
  0x51   : >> { %866 = vmatpush.bf16.msrb.mxu3 %v1483_v48 }
  0x53   : >> { %828 = vmatpush.bf16.msrb.mxu0 %v1455_v54 }
  0x54   : >> { %841 = vmatpush.bf16.msrb.mxu1 %v1459_v56  ;;  %854 = vmatpush.bf16.msrb.mxu2 %v1463_v57 }
  0x55   : >> { %867 = vmatpush.bf16.msrb.mxu3 %v1467_v61  ;;  %v2220_v61 = vld [vmem:[%s910_s12] sm:$0xff] }
  0x56   : >> { %v912_v5 = vunpack.c.l.bf16 %v2220_v61  ;;  %v913_v38 = vunpack.c.h.bf16 %v2220_v61 }
  0x57   : >> { %829 = vmatpush.bf16.msrb.mxu0 %v1439_v6  ;;  %v927_v6 = vperm.slane %v1793_v3, 0 }
  0x58   : >> { %842 = vmatpush.bf16.msrb.mxu1 %v1443_v7  ;;  %855 = vmatpush.bf16.msrb.mxu2 %v1447_v8 }
  0x59   : >> { %868 = vmatpush.bf16.msrb.mxu3 %v1451_v12 }
  0x5b   : >> { %830 = vmatpush.bf16.msrb.mxu0 %v1423_v18 }
  0x5c   : >> { %843 = vmatpush.bf16.msrb.mxu1 %v1427_v20  ;;  %856 = vmatpush.bf16.msrb.mxu2 %v1431_v21 }
  0x5d   : >> { %869 = vmatpush.bf16.msrb.mxu3 %v1435_v22 }
  0x5e   : >> { %831 = vmatmul.bf16.vlgmr.msrb.gmra.mxu0 %v629_v23 }
  0x5f   : >> { %844 = vmatmul.bf16.vlgmr.msrb.gmra.mxu1 %v629_v23  ;;  %857 = vmatmul.bf16.vlgmr.msrb.gmra.mxu2 %v629_v23 }
  0x60   : >> { %870 = vmatmul.bf16.vlgmr.msrb.gmra.mxu3 %v629_v23 }
  0xbb   : >> { %v586_v31 = vpop.f32.mrf.mxu0 }
  0xbc   : >> { %v599_v28 = vpop.f32.mrf.mxu1 }
  0xbd   : >> { %v885_v30 = vrot.slane %v599_v28, 4 }
  0xbf   : >> { %v888_v33 = vsel %vm887_vm2, %v586_v31, %v885_v30  ;;  %v933_v31 = vsel %vm887_vm2, %v927_v6, %v931_v15 }
  0xc0   : >> { %v892_v35 = vadd.f32 %v888_v33, %v879_v29 }
  0xc2   : >> { %v905_v36 = vadd.f32 %v901_v34, %v892_v35 }
  0xc3   : >> { %v588_v47 = vpop.f32.mrf.mxu0 }
  0xc4   : >> { %v1552_v41 = vmul.f32 -1.442695, %v905_v36  ;;  %v959_v42 = vrot.slane %v905_v36, 4  ;;  %v601_v44 = vpop.f32.mrf.mxu1  ;;  %v612_v45 = vpop.f32.mrf.mxu2  ;;  %v381_v36 = vld [vmem:[#allocation3] sm:$0xf] }
  0xc5   : >> { %v625_v39 = vpop.f32.mrf.mxu3  ;;  %v932_v44 = vrot.slane %v930_v26, 4 }
  0xc6   : >> { %v886_v43 = vrot.slane %v625_v39, 4  ;;  %1648 = vpow2.f32 %v1552_v41  ;;  %v1553_v48 = vmul.f32 -1.442695, %v959_v42  ;;  %v929_v39 = vperm.slane %v1793_v3, 2 }
  0xc8   : >> { %v889_v49 = vsel %vm887_vm2, %v612_v45, %v886_v43  ;;  %1650 = vpow2.f32 %v1553_v48  ;;  %v1084_v43 = vpop.permute.xlu0 %1083 }
  0xc9   : >> { %v893_v51 = vadd.f32 %v889_v49, %v880_v40  ;;  %vm1085_vm13 = vcmp.eq.s32.totalorder %v1084_v43, 1  ;;  %v383_v43 = vld [vmem:[#allocation3 + $0x4] sm:$0xf] }
  0xcb   : >> { %v906_v52 = vadd.f32 %v902_v50, %v893_v51 }
  0xcc   : >> { %v1649_v55 = vpop.eup %1648  ;;  %v614_v56 = vpop.f32.mrf.mxu2 }
  0xcd   : >> { %v982_v53 = vrot.slane %v906_v52, 4  ;;  %v627_v54 = vpop.f32.mrf.mxu3  ;;  %v942_v57 = vadd.f32 1.0, %v1649_v55 }
  0xce   : >> { %v1651_v59 = vpop.eup %1650 }
  0xcf   : >> { %v1554_v58 = vmul.f32 -1.442695, %v982_v53  ;;  %1652 = vrcp.f32 %v942_v57  ;;  %v964_v60 = vadd.f32 1.0, %v1651_v59  ;;  %vm948_vm3 = vweird.f32 %v942_v57 }
  0xd0   : >> { %v954_v9 = vand.u32 2147483648, %v942_v57  ;;  %v952_v11 = vand.u32 2147483647, %v942_v57 }
  0xd1   : >> { %1654 = vpow2.f32 %v1554_v58  ;;  %vm970_vm5 = vweird.f32 %v964_v60  ;;  %v976_v14 = vand.u32 2147483648, %v964_v60  ;;  %v974_v20 = vand.u32 2147483647, %v964_v60 }
  0xd2   : >> { %1656 = vrcp.f32 %v964_v60  ;;  %v955_v23 = vor.u32 1.1754944e-38, %v954_v9  ;;  %vm953_vm8 = vcmp.eq.f32.partialorder %v952_v11, 8.507059e+37 }
  0xd3   : >> { %1658 = vtanh.f32 %v906_v52  ;;  %v977_v30 = vor.u32 1.1754944e-38, %v976_v14  ;;  %vm975_vm10 = vcmp.eq.f32.partialorder %v974_v20, 8.507059e+37 }
  0xd5   : >> { %v1653_v62 = vpop.eup %1652 }
  0xd6   : >> { %v944_v4 = vmul.f32 %v1653_v62, %v942_v57  ;;  %vm949_vm4 = vweird.f32 %v1653_v62 }
  0xd7   : >> { %v1655_v0 = vpop.eup %1654  ;;  %vm2229_vm7 = vmor %vm948_vm3, %vm949_vm4 }
  0xd8   : >> { %v1657_v7 = vpop.eup %1656  ;;  %v2225_v8 = vadd.f32 1.0, %v1655_v0  ;;  %v945_v10 = vsub.f32 1.0, %v944_v4 }
  0xd9   : >> { %v966_v12 = vmul.f32 %v1657_v7, %v964_v60  ;;  %vm971_vm6 = vweird.f32 %v1657_v7  ;;  %v1659_v27 = vpop.eup %1658 }
  0xda   : >> { %1660 = vrcp.f32 %v2225_v8  ;;  %v946_v17 = vmul.f32 %v1653_v62, %v945_v10  ;;  %vm2236_vm9 = vmor %vm970_vm5, %vm971_vm6  ;;  %vm993_vm11 = vweird.f32 %v2225_v8  ;;  %v999_v49 = vand.u32 2147483648, %v2225_v8 }
  0xdb   : >> { %v832_v13 = vpop.f32.mrf.mxu0  ;;  %v967_v18 = vsub.f32 1.0, %v966_v12  ;;  %v997_v56 = vand.u32 2147483647, %v2225_v8 }
  0xdc   : >> { %v845_v16 = vpop.f32.mrf.mxu1  ;;  %v947_v24 = vadd.f32 %v1653_v62, %v946_v17  ;;  %v1000_v6 = vor.u32 1.1754944e-38, %v999_v49  ;;  %v1093_v49 = vpop.permute.xlu0 %1092 }
  0xdd   : >> { %v918_v21 = vrot.slane %v845_v16, 4  ;;  %v968_v25 = vmul.f32 %v1657_v7, %v967_v18  ;;  %vm998_vm15 = vcmp.eq.f32.partialorder %v997_v56, 8.507059e+37 }
  0xde   : >> { %v951_v32 = vsel %vm2229_vm7, %v1653_v62, %v947_v24  ;;  %v934_v62 = vsel %vm887_vm2, %v929_v39, %v932_v44 }
  0xdf   : >> { %v920_v28 = vsel %vm887_vm2, %v832_v13, %v918_v21  ;;  %v969_v33 = vadd.f32 %v1657_v7, %v968_v25  ;;  %v956_v37 = vsel %vm953_vm8, %v955_v23, %v951_v32  ;;  %vm1094_vm8 = vcmp.eq.s32.totalorder %v1093_v49, 1 }
  0xe0   : >> { %v924_v34 = vadd.f32 %v920_v28, %v912_v5  ;;  %v1661_v35 = vpop.eup %1660  ;;  %v1004_v55 = vmul.f32 %v1659_v27, %v956_v37 }
  0xe1   : >> { %v973_v41 = vsel %vm2236_vm9, %v1657_v7, %v969_v33  ;;  %v989_v42 = vmul.f32 %v1661_v35, %v2225_v8  ;;  %vm994_vm12 = vweird.f32 %v1661_v35 }
  0xe2   : >> { %v858_v40 = vpop.f32.mrf.mxu2  ;;  %v978_v48 = vsel %vm975_vm10, %v977_v30, %v973_v41  ;;  %v937_v50 = vadd.f32 %v933_v31, %v924_v34  ;;  %vm2256_vm14 = vmor %vm993_vm11, %vm994_vm12 }
  0xe3   : >> { %v871_v45 = vpop.f32.mrf.mxu3  ;;  %v834_v47 = vpop.f32.mrf.mxu0  ;;  %v990_v53 = vsub.f32 1.0, %v989_v42  ;;  %v1003_v54 = vmul.f32 %v978_v48, %v381_v36 }
  0xe4   : >> { %v919_v51 = vrot.slane %v871_v45, 4  ;;  %v847_v52 = vpop.f32.mrf.mxu1  ;;  %v1555_v57 = vmul.f32 -1.442695, %v937_v50  ;;  %v1028_v58 = vrot.slane %v937_v50, 4 }
  0xe5   : >> { %v991_v60 = vmul.f32 %v1661_v35, %v990_v53  ;;  %v1005_v61 = vadd.f32 %v1004_v55, %v1003_v54 }
  0xe6   : >> { %v921_v59 = vsel %vm887_vm2, %v858_v40, %v919_v51  ;;  %1662 = vpow2.f32 %v1555_v57  ;;  %v1556_v4 = vmul.f32 -1.442695, %v1028_v58 }
  0xe7   : >> { %v925_v0 = vadd.f32 %v921_v59, %v913_v38  ;;  %v992_v5 = vadd.f32 %v1661_v35, %v991_v60  ;;  %1664 = vtanh.f32 %v1005_v61  ;;  %v1088_v7 = vsel %vm1085_vm13, %v1005_v61, %v381_v36 }
  0xe8   : >> { %1089 = vst [vmem:[#allocation3] sm:$0xf] %v1088_v7  ;;  %1666 = vpow2.f32 %v1556_v4 }
  0xe9   : >> { %v938_v9 = vadd.f32 %v934_v62, %v925_v0  ;;  %v996_v8 = vsel %vm2256_vm14, %v1661_v35, %v992_v5 }
  0xea   : >> { %v860_v10 = vpop.f32.mrf.mxu2  ;;  %v1001_v13 = vsel %vm998_vm15, %v1000_v6, %v996_v8 }
  0xeb   : >> { %v873_v11 = vpop.f32.mrf.mxu3  ;;  %v1051_v12 = vrot.slane %v938_v9, 4 }
  0xec   : >> { %v1663_v14 = vpop.eup %1662 }
  0xed   : >> { %v1557_v15 = vmul.f32 -1.442695, %v1051_v12  ;;  %v1665_v16 = vpop.eup %1664  ;;  %v1011_v17 = vadd.f32 1.0, %v1663_v14 }
  0xee   : >> { %v1667_v18 = vpop.eup %1666  ;;  %v1007_v20 = vmul.f32 %v1665_v16, %v1001_v13 }
  0xef   : >> { %1668 = vpow2.f32 %v1557_v15  ;;  %v1033_v23 = vadd.f32 1.0, %v1667_v18  ;;  %v1023_v32 = vand.u32 2147483648, %v1011_v17  ;;  %v1021_v33 = vand.u32 2147483647, %v1011_v17 }
  0xf0   : >> { %1670 = vrcp.f32 %v1011_v17  ;;  %v1086_v21 = vsel %vm1085_vm13, %v1007_v20, %v2016_v46  ;;  %v1099_v22 = vsel %vm1085_vm13, %v1007_v20, 0.0  ;;  %vm1017_vm1 = vweird.f32 %v1011_v17 }
  0xf1   : >> { %1087 = vst [vmem:[#allocation2] sm:$0xf] %v1086_v21  ;;  %1672 = vrcp.f32 %v1033_v23  ;;  %v1045_v35 = vand.u32 2147483648, %v1033_v23  ;;  %v1043_v38 = vand.u32 2147483647, %v1033_v23  ;;  %v1024_v40 = vor.u32 1.1754944e-38, %v1023_v32 }
  0xf2   : >> { %1101 = vst [vmem:[%s1100_s16] sm:$0xf] %v1099_v22  ;;  %vm1022_vm4 = vcmp.eq.f32.partialorder %v1021_v33, 8.507059e+37  ;;  %vm1039_vm5 = vweird.f32 %v1033_v23 }
  0xf3   : >> { %v1046_v45 = vor.u32 1.1754944e-38, %v1045_v35  ;;  %vm1044_vm7 = vcmp.eq.f32.partialorder %v1043_v38, 8.507059e+37 }
  0xf5   : >> { %v1669_v24 = vpop.eup %1668 }
  0xf6   : >> { %v1671_v25 = vpop.eup %1670  ;;  %v1056_v26 = vadd.f32 1.0, %v1669_v24 }
  0xf7   : >> { %v1013_v27 = vmul.f32 %v1671_v25, %v1011_v17  ;;  %v1673_v28 = vpop.eup %1672  ;;  %vm1018_vm0 = vweird.f32 %v1671_v25 }
  0xf8   : >> { %1674 = vrcp.f32 %v1056_v26  ;;  %v1035_v30 = vmul.f32 %v1673_v28, %v1033_v23  ;;  %vm1019_vm2 = vmor %vm1017_vm1, %vm1018_vm0  ;;  %vm1040_vm3 = vweird.f32 %v1673_v28  ;;  %v1068_v57 = vand.u32 2147483648, %v1056_v26 }
  0xf9   : >> { %v1014_v29 = vsub.f32 1.0, %v1013_v27  ;;  %1676 = vtanh.f32 %v938_v9  ;;  %vm1041_vm6 = vmor %vm1039_vm5, %vm1040_vm3  ;;  %vm1062_vm10 = vweird.f32 %v1056_v26  ;;  %v1066_v59 = vand.u32 2147483647, %v1056_v26 }
  0xfa   : >> { %v1036_v34 = vsub.f32 1.0, %v1035_v30  ;;  %v1069_v61 = vor.u32 1.1754944e-38, %v1068_v57 }
  0xfb   : >> { %v1015_v31 = vmul.f32 %v1671_v25, %v1014_v29  ;;  %vm1067_vm12 = vcmp.eq.f32.partialorder %v1066_v59, 8.507059e+37 }
  0xfc   : >> { %v1037_v37 = vmul.f32 %v1673_v28, %v1036_v34 }
  0xfd   : >> { %v1016_v46 = vadd.f32 %v1671_v25, %v1015_v31 }
  0xfe   : >> { %v1675_v36 = vpop.eup %1674  ;;  %v1038_v42 = vadd.f32 %v1673_v28, %v1037_v37 }
  0xff   : >> { %v1020_v39 = vsel %vm1019_vm2, %v1671_v25, %v1016_v46  ;;  %v1058_v41 = vmul.f32 %v1675_v36, %v1056_v26  ;;  %v1677_v50 = vpop.eup %1676  ;;  %vm1063_vm9 = vweird.f32 %v1675_v36 }
 0x100   : >> { %v1025_v44 = vsel %vm1022_vm4, %v1024_v40, %v1020_v39  ;;  %v1042_v48 = vsel %vm1041_vm6, %v1673_v28, %v1038_v42  ;;  %vm1064_vm11 = vmor %vm1062_vm10, %vm1063_vm9 }
 0x101   : >> { %v1059_v47 = vsub.f32 1.0, %v1058_v41  ;;  %v1047_v51 = vsel %vm1044_vm7, %v1046_v45, %v1042_v48  ;;  %v1073_v54 = vmul.f32 %v1677_v50, %v1025_v44 }
 0x102   : >> { %v1072_v53 = vmul.f32 %v1047_v51, %v383_v43 }
 0x103   : >> { %v1060_v52 = vmul.f32 %v1675_v36, %v1059_v47 }
 0x104   : >> { %v1074_v55 = vadd.f32 %v1073_v54, %v1072_v53 }
 0x105   : >> { %v1061_v56 = vadd.f32 %v1675_v36, %v1060_v52 }
 0x106   : >> { %1678 = vtanh.f32 %v1074_v55  ;;  %v1097_v58 = vsel %vm1094_vm8, %v1074_v55, %v383_v43 }
 0x107   : >> { %1098 = vst [vmem:[#allocation3 + $0x4] sm:$0xf] %v1097_v58  ;;  %v1065_v60 = vsel %vm1064_vm11, %v1675_v36, %v1061_v56 }
 0x108   : >> { %v1070_v63 = vsel %vm1067_vm12, %v1069_v61, %v1065_v60 }
 0x10c   : >> { %v1679_v62 = vpop.eup %1678 }
 0x10d   : >> { %v1076_v0 = vmul.f32 %v1679_v62, %v1070_v63  ;;  %374 = sbr.rel (!%p372_p6) target bundleno = 28 (0x1c), region = 124 }
 0x10f   : >> { %v1095_v4 = vsel %vm1094_vm8, %v1076_v0, %v2202_v19  ;;  %v1102_v5 = vsel %vm1094_vm8, %v1076_v0, 0.0 }
 0x110   : >> { %1096 = vst [vmem:[#allocation2 + $0x4] sm:$0xf] %v1095_v4 }
 0x111   : >> { %1104 = vst [vmem:[%s1103_s21] sm:$0xf] %v1102_v5 }
 0x112   : > { %1108 = sbr.rel (%p1558_p7) target bundleno = 282 (0x11a), region = 55 }
 0x117   : > { %v1109_v6 = vld [vmem:[#allocation2] sm:$0xff]   ;;  %v1113_v7 = vld [vmem:[#allocation3] sm:$0xff]  }
 0x118   : > { %1111 = vst [vmem:[%s2295_s7] sm:$0xff] %v1109_v6  }
 0x119   : > { %1115 = vst [vmem:[%s2296_s8] sm:$0xff] %v1113_v7  }
 0x11a PF: > { %s19_s27 = sadd.s32 1, %s1690_s27  }
 0x11b   : > { %p16_p8 = scmp.ge.s32.totalorder %s19_s27, 5  }
 0x11d   :  { %18 = sbr.rel (!%p16_p8) target bundleno = 1 (0x1), region = 135 }

</bundles_post_ra>
